<compile_context>
chip_gen: v5e
topology: v5e:2x2
jax: 0.10.0
libtpu: 0.0.40
codegen_flags: <defaults>
</compile_context>

<pallas_src>
import functools
import math

import jax
import jax.numpy as jnp
from jax.experimental import pallas as pl
from jax.experimental.pallas import tpu as pltpu

LANES = 128     # lane width (fixed by hardware vreg layout)
TR_MAX = 1024   # max sublane rows per grid step (512 KiB per f32 input block)


def _combined_loss_kernel(in1_ref, tg1_ref, in2_ref, tg2_ref, out_ref,
                          acc_prod, acc_sum, acc_sq,
                          *, threshold, smooth, weight_dice, weight_mse,
                          n_valid, n_mse, tr):
    """Streams (tr, 128) tiles and accumulates the three global sums needed:

      acc_prod : sum(input1 * target1)            (Dice intersection)
      acc_sum  : sum(input1 + target1)            (Dice denominator)
      acc_sq   : sum((input2 * mask - target2)^2) (MSE numerator)
    """
    i = pl.program_id(0)

    @pl.when(i == 0)
    def _():
        acc_prod[...] = jnp.zeros_like(acc_prod)
        acc_sum[...] = jnp.zeros_like(acc_sum)
        acc_sq[...] = jnp.zeros_like(acc_sq)

    # Validity mask: the final grid block may run past the end of the array
    # (Pallas pads it with unspecified values), and the flat vector may have
    # been padded by <128 zeros for the (rows, 128) reshape.  Masking by the
    # static element count handles both without relying on padding values.
    row = jax.lax.broadcasted_iota(jnp.int32, (tr, LANES), 0)
    lane = jax.lax.broadcasted_iota(jnp.int32, (tr, LANES), 1)
    elem = (i * tr + row) * LANES + lane
    valid = elem < n_valid

    x1 = jnp.where(valid, in1_ref[...].astype(jnp.float32), 0.0)
    t1 = jnp.where(valid, tg1_ref[...].astype(jnp.float32), 0.0)
    x2 = jnp.where(valid, in2_ref[...].astype(jnp.float32), 0.0)
    t2 = jnp.where(valid, tg2_ref[...].astype(jnp.float32), 0.0)

    masked2 = jnp.where(x1 > threshold, x2, 0.0)   # input2 * (input1 > thr)
    diff = masked2 - t2

    # Full-tile vector accumulation (VALU only; no per-step cross-lane reduce).
    acc_prod[...] += x1 * t1
    acc_sum[...] += x1 + t1
    acc_sq[...] += diff * diff

    @pl.when(i == pl.num_programs(0) - 1)
    def _():
        intersection = jnp.sum(acc_prod[...])
        denom = jnp.sum(acc_sum[...])
        sq_err = jnp.sum(acc_sq[...])
        dice = (2.0 * intersection + smooth) / (denom + smooth)
        loss_dice = 1.0 - dice
        loss_mse = sq_err / n_mse
        out_ref[0] = weight_dice * loss_dice + weight_mse * loss_mse


def _flatten_rows(x):
    """Ravel in native dtype and view as (rows, 128).

    Only pads (with zeros) when the element count is not a multiple of 128;
    the padded tail is masked out inside the kernel anyway.
    """
    x = jnp.ravel(x)
    n = x.shape[0]
    pad = (-n) % LANES
    if pad:
        x = jnp.pad(x, (0, pad))
    return x.reshape(-1, LANES)


def combined_loss(input1, target1, input2, target2,
                  weight_dice=0.5, weight_mse=0.5,
                  threshold=0.5, smooth=10000.0):
    n_valid = math.prod(input1.shape)
    # MSE mean divisor (matches target2.squeeze() element count in the module).
    n_mse = float(math.prod(input2.shape))
    # TODO(synk): kernel assumes input1/target1/input2/target2 all have the
    # same element count (the usual case); general broadcasting of the mask
    # against a differently-shaped input2 is not handled.

    a1 = _flatten_rows(input1)
    b1 = _flatten_rows(target1)
    a2 = _flatten_rows(input2)
    b2 = _flatten_rows(target2)

    rows = a1.shape[0]
    # Largest tile that fits comfortably in scoped VMEM on all generations;
    # for small inputs use the whole array as a single block.
    tr = rows if rows <= TR_MAX else TR_MAX
    grid = (pl.cdiv(rows, tr),)

    kernel = functools.partial(
        _combined_loss_kernel,
        threshold=float(threshold),
        smooth=float(smooth),
        weight_dice=float(weight_dice),
        weight_mse=float(weight_mse),
        n_valid=int(n_valid),
        n_mse=n_mse,
        tr=tr,
    )

    block = pl.BlockSpec((tr, LANES), lambda i: (i, 0))

    out = pl.pallas_call(
        kernel,
        out_shape=jax.ShapeDtypeStruct((1,), jnp.float32),
        grid_spec=pltpu.PrefetchScalarGridSpec(
            num_scalar_prefetch=0,
            grid=grid,
            in_specs=[block, block, block, block],
            out_specs=pl.BlockSpec(memory_space=pltpu.MemorySpace.SMEM),
            scratch_shapes=[
                pltpu.VMEM((tr, LANES), jnp.float32),  # acc_prod
                pltpu.VMEM((tr, LANES), jnp.float32),  # acc_sum
                pltpu.VMEM((tr, LANES), jnp.float32),  # acc_sq
            ],
        ),
        compiler_params=pltpu.CompilerParams(
            dimension_semantics=("arbitrary",)),  # sequential accumulation
    )(a1, b1, a2, b2)
    return out[0]


def _reference(input1, target1, input2, target2,
               weight_dice=0.5, weight_mse=0.5, threshold=0.5, smooth=10000.0):
    i1 = input1.astype(jnp.float32).reshape(-1)
    t1 = target1.astype(jnp.float32).reshape(-1)
    inter = jnp.sum(i1 * t1)
    dice = (2.0 * inter + smooth) / (jnp.sum(i1) + jnp.sum(t1) + smooth)
    loss_dice = 1.0 - dice
    mask = (input1.astype(jnp.float32) > threshold).astype(jnp.float32)
    masked = input2.astype(jnp.float32) * mask
    loss_mse = jnp.mean((masked - target2.astype(jnp.float32)) ** 2)
    return weight_dice * loss_dice + weight_mse * loss_mse


if __name__ == "__main__":
    key = jax.random.PRNGKey(0)
    k1, k2, k3, k4 = jax.random.split(key, 4)

    shape = (2, 4, 16, 16)  # NCHW-style tensors fed to the losses
    input1 = jax.random.uniform(k1, shape, dtype=jnp.float32)            # e.g. sigmoid probs
    target1 = (jax.random.uniform(k2, shape) > 0.5).astype(jnp.float32)  # binary mask target
    input2 = jax.random.normal(k3, shape, dtype=jnp.float32)
    target2 = jax.random.normal(k4, shape, dtype=jnp.float32)

    loss = combined_loss(input1, target1, input2, target2)
    loss = jax.block_until_ready(loss)

    ref = _reference(input1, target1, input2, target2)
    assert jnp.allclose(loss, ref, rtol=1e-5, atol=1e-6), (loss, ref)

    print("KERNEL_OK")
</pallas_src>

<mosaic_0001>
module attributes {stable_mosaic.version = 11 : i64} {
  func.func @_combined_loss_kernel(%arg0: i32, %arg1: memref<16x128xf32, #tpu.memory_space<vmem>>, %arg2: memref<16x128xf32, #tpu.memory_space<vmem>>, %arg3: memref<16x128xf32, #tpu.memory_space<vmem>>, %arg4: memref<16x128xf32, #tpu.memory_space<vmem>>, %arg5: memref<1xf32, #tpu.memory_space<smem>>, %arg6: memref<16x128xf32, #tpu.memory_space<vmem>>, %arg7: memref<16x128xf32, #tpu.memory_space<vmem>>, %arg8: memref<16x128xf32, #tpu.memory_space<vmem>>) attributes {dimension_semantics = [#tpu.dimension_semantics<arbitrary>], iteration_bounds = array<i64: 1>, scalar_prefetch = 0 : i64, scratch_operands = 3 : i64, tpu.core_type = #tpu.core_type<tc>, window_params = [{transform_indices = @transform_0, window_bounds = array<i64: 16, 128>}, {transform_indices = @transform_1, window_bounds = array<i64: 16, 128>}, {transform_indices = @transform_2, window_bounds = array<i64: 16, 128>}, {transform_indices = @transform_3, window_bounds = array<i64: 16, 128>}, {transform_indices = @transform_4, window_bounds = array<i64: 1>}]} {
    %c0_i32 = arith.constant 0 : i32
    %0 = arith.cmpi eq, %arg0, %c0_i32 : i32
    %1 = arith.extui %0 : i1 to i32
    %c0_i32_0 = arith.constant 0 : i32
    %2 = arith.cmpi ne, %1, %c0_i32_0 : i32
    scf.if %2 {
      %cst_27 = arith.constant 0.000000e+00 : f32
      %45 = vector.broadcast %cst_27 : f32 to vector<16x128xf32>
      %c0_28 = arith.constant 0 : index
      %c0_29 = arith.constant 0 : index
      %46 = vector.load %arg6[%c0_28, %c0_29] : memref<16x128xf32, #tpu.memory_space<vmem>>, vector<16x128xf32>
      tpu.vector_store %arg6[%c0_28, %c0_29], %45 {strides = array<i32>} : memref<16x128xf32, #tpu.memory_space<vmem>>, vector<16x128xf32>,
      %cst_30 = arith.constant 0.000000e+00 : f32
      %47 = vector.broadcast %cst_30 : f32 to vector<16x128xf32>
      %c0_31 = arith.constant 0 : index
      %c0_32 = arith.constant 0 : index
      %48 = vector.load %arg7[%c0_31, %c0_32] : memref<16x128xf32, #tpu.memory_space<vmem>>, vector<16x128xf32>
      tpu.vector_store %arg7[%c0_31, %c0_32], %47 {strides = array<i32>} : memref<16x128xf32, #tpu.memory_space<vmem>>, vector<16x128xf32>,
      %cst_33 = arith.constant 0.000000e+00 : f32
      %49 = vector.broadcast %cst_33 : f32 to vector<16x128xf32>
      %c0_34 = arith.constant 0 : index
      %c0_35 = arith.constant 0 : index
      %50 = vector.load %arg8[%c0_34, %c0_35] : memref<16x128xf32, #tpu.memory_space<vmem>>, vector<16x128xf32>
      tpu.vector_store %arg8[%c0_34, %c0_35], %49 {strides = array<i32>} : memref<16x128xf32, #tpu.memory_space<vmem>>, vector<16x128xf32>,
    } else {
    }
    %3 = tpu.iota {dimensions = array<i32: 0>} : vector<16x128xi32>
    %4 = tpu.iota {dimensions = array<i32: 1>} : vector<16x128xi32>
    %c16_i32 = arith.constant 16 : i32
    %5 = arith.muli %arg0, %c16_i32 : i32
    %6 = vector.broadcast %5 : i32 to vector<16x128xi32>
    %7 = arith.addi %6, %3 : vector<16x128xi32>
    %c128_i32 = arith.constant 128 : i32
    %8 = vector.broadcast %c128_i32 : i32 to vector<16x128xi32>
    %9 = arith.muli %7, %8 : vector<16x128xi32>
    %10 = arith.addi %9, %4 : vector<16x128xi32>
    %c2048_i32 = arith.constant 2048 : i32
    %11 = vector.broadcast %c2048_i32 : i32 to vector<16x128xi32>
    %12 = arith.cmpi slt, %10, %11 : vector<16x128xi32>
    %c0 = arith.constant 0 : index
    %c0_1 = arith.constant 0 : index
    %13 = vector.load %arg1[%c0, %c0_1] : memref<16x128xf32, #tpu.memory_space<vmem>>, vector<16x128xf32>
    %cst = arith.constant 0.000000e+00 : f32
    %14 = vector.broadcast %cst : f32 to vector<16x128xf32>
    %15 = arith.select %12, %13, %14 : vector<16x128xi1>, vector<16x128xf32>
    %c0_2 = arith.constant 0 : index
    %c0_3 = arith.constant 0 : index
    %16 = vector.load %arg2[%c0_2, %c0_3] : memref<16x128xf32, #tpu.memory_space<vmem>>, vector<16x128xf32>
    %cst_4 = arith.constant 0.000000e+00 : f32
    %17 = vector.broadcast %cst_4 : f32 to vector<16x128xf32>
    %18 = arith.select %12, %16, %17 : vector<16x128xi1>, vector<16x128xf32>
    %c0_5 = arith.constant 0 : index
    %c0_6 = arith.constant 0 : index
    %19 = vector.load %arg3[%c0_5, %c0_6] : memref<16x128xf32, #tpu.memory_space<vmem>>, vector<16x128xf32>
    %cst_7 = arith.constant 0.000000e+00 : f32
    %20 = vector.broadcast %cst_7 : f32 to vector<16x128xf32>
    %21 = arith.select %12, %19, %20 : vector<16x128xi1>, vector<16x128xf32>
    %c0_8 = arith.constant 0 : index
    %c0_9 = arith.constant 0 : index
    %22 = vector.load %arg4[%c0_8, %c0_9] : memref<16x128xf32, #tpu.memory_space<vmem>>, vector<16x128xf32>
    %cst_10 = arith.constant 0.000000e+00 : f32
    %23 = vector.broadcast %cst_10 : f32 to vector<16x128xf32>
    %24 = arith.select %12, %22, %23 : vector<16x128xi1>, vector<16x128xf32>
    %cst_11 = arith.constant 5.000000e-01 : f32
    %25 = vector.broadcast %cst_11 : f32 to vector<16x128xf32>
    %26 = arith.cmpf ogt, %15, %25 : vector<16x128xf32>
    %cst_12 = arith.constant 0.000000e+00 : f32
    %27 = vector.broadcast %cst_12 : f32 to vector<16x128xf32>
    %28 = arith.select %26, %21, %27 : vector<16x128xi1>, vector<16x128xf32>
    %29 = arith.subf %28, %24 : vector<16x128xf32>
    %c0_13 = arith.constant 0 : index
    %c0_14 = arith.constant 0 : index
    %30 = vector.load %arg6[%c0_13, %c0_14] : memref<16x128xf32, #tpu.memory_space<vmem>>, vector<16x128xf32>
    %31 = arith.mulf %15, %18 : vector<16x128xf32>
    %32 = arith.addf %30, %31 : vector<16x128xf32>
    %c0_15 = arith.constant 0 : index
    %c0_16 = arith.constant 0 : index
    %33 = vector.load %arg6[%c0_15, %c0_16] : memref<16x128xf32, #tpu.memory_space<vmem>>, vector<16x128xf32>
    tpu.vector_store %arg6[%c0_15, %c0_16], %32 {strides = array<i32>} : memref<16x128xf32, #tpu.memory_space<vmem>>, vector<16x128xf32>,
    %c0_17 = arith.constant 0 : index
    %c0_18 = arith.constant 0 : index
    %34 = vector.load %arg7[%c0_17, %c0_18] : memref<16x128xf32, #tpu.memory_space<vmem>>, vector<16x128xf32>
    %35 = arith.addf %15, %18 : vector<16x128xf32>
    %36 = arith.addf %34, %35 : vector<16x128xf32>
    %c0_19 = arith.constant 0 : index
    %c0_20 = arith.constant 0 : index
    %37 = vector.load %arg7[%c0_19, %c0_20] : memref<16x128xf32, #tpu.memory_space<vmem>>, vector<16x128xf32>
    tpu.vector_store %arg7[%c0_19, %c0_20], %36 {strides = array<i32>} : memref<16x128xf32, #tpu.memory_space<vmem>>, vector<16x128xf32>,
    %c0_21 = arith.constant 0 : index
    %c0_22 = arith.constant 0 : index
    %38 = vector.load %arg8[%c0_21, %c0_22] : memref<16x128xf32, #tpu.memory_space<vmem>>, vector<16x128xf32>
    %39 = arith.mulf %29, %29 : vector<16x128xf32>
    %40 = arith.addf %38, %39 : vector<16x128xf32>
    %c0_23 = arith.constant 0 : index
    %c0_24 = arith.constant 0 : index
    %41 = vector.load %arg8[%c0_23, %c0_24] : memref<16x128xf32, #tpu.memory_space<vmem>>, vector<16x128xf32>
    tpu.vector_store %arg8[%c0_23, %c0_24], %40 {strides = array<i32>} : memref<16x128xf32, #tpu.memory_space<vmem>>, vector<16x128xf32>,
    %c0_i32_25 = arith.constant 0 : i32
    %42 = arith.cmpi eq, %arg0, %c0_i32_25 : i32
    %43 = arith.extui %42 : i1 to i32
    %c0_i32_26 = arith.constant 0 : i32
    %44 = arith.cmpi ne, %43, %c0_i32_26 : i32
    scf.if %44 {
      %c0_27 = arith.constant 0 : index
      %c0_28 = arith.constant 0 : index
      %45 = vector.load %arg6[%c0_27, %c0_28] : memref<16x128xf32, #tpu.memory_space<vmem>>, vector<16x128xf32>
      %46 = vector.shape_cast %45 : vector<16x128xf32> to vector<1x16x128xf32>
      %cst_29 = arith.constant dense<0.000000e+00> : vector<1xf32>
      %47 = vector.multi_reduction <add>, %46, %cst_29 [1, 2] : vector<1x16x128xf32> to vector<1xf32>
      %48 = vector.shape_cast %47 : vector<1xf32> to vector<1x1x1xf32>
      %49 = vector.extract %48[0, 0, 0] : f32 from vector<1x1x1xf32>
      %c0_30 = arith.constant 0 : index
      %c0_31 = arith.constant 0 : index
      %50 = vector.load %arg7[%c0_30, %c0_31] : memref<16x128xf32, #tpu.memory_space<vmem>>, vector<16x128xf32>
      %51 = vector.shape_cast %50 : vector<16x128xf32> to vector<1x16x128xf32>
      %cst_32 = arith.constant dense<0.000000e+00> : vector<1xf32>
      %52 = vector.multi_reduction <add>, %51, %cst_32 [1, 2] : vector<1x16x128xf32> to vector<1xf32>
      %53 = vector.shape_cast %52 : vector<1xf32> to vector<1x1x1xf32>
      %54 = vector.extract %53[0, 0, 0] : f32 from vector<1x1x1xf32>
      %c0_33 = arith.constant 0 : index
      %c0_34 = arith.constant 0 : index
      %55 = vector.load %arg8[%c0_33, %c0_34] : memref<16x128xf32, #tpu.memory_space<vmem>>, vector<16x128xf32>
      %56 = vector.shape_cast %55 : vector<16x128xf32> to vector<1x16x128xf32>
      %cst_35 = arith.constant dense<0.000000e+00> : vector<1xf32>
      %57 = vector.multi_reduction <add>, %56, %cst_35 [1, 2] : vector<1x16x128xf32> to vector<1xf32>
      %58 = vector.shape_cast %57 : vector<1xf32> to vector<1x1x1xf32>
      %59 = vector.extract %58[0, 0, 0] : f32 from vector<1x1x1xf32>
      %cst_36 = arith.constant 2.000000e+00 : f32
      %60 = arith.mulf %cst_36, %49 : f32
      %cst_37 = arith.constant 1.000000e+04 : f32
      %61 = arith.addf %60, %cst_37 : f32
      %cst_38 = arith.constant 1.000000e+04 : f32
      %62 = arith.addf %54, %cst_38 : f32
      %63 = arith.divf %61, %62 : f32
      %cst_39 = arith.constant 1.000000e+00 : f32
      %64 = arith.subf %cst_39, %63 : f32
      %cst_40 = arith.constant 2.048000e+03 : f32
      %65 = arith.divf %59, %cst_40 : f32
      %cst_41 = arith.constant 5.000000e-01 : f32
      %66 = arith.mulf %cst_41, %64 : f32
      %cst_42 = arith.constant 5.000000e-01 : f32
      %67 = arith.mulf %cst_42, %65 : f32
      %68 = arith.addf %66, %67 : f32
      %c0_43 = arith.constant 0 : index
      %69 = memref.load %arg5[%c0_43] : memref<1xf32, #tpu.memory_space<smem>>
      memref.store %68, %arg5[%c0_43] : memref<1xf32, #tpu.memory_space<smem>>
    } else {
    }
    return
  }
  func.func @transform_0(%arg0: i32) -> (i32, i32) {
    %c0_i32 = arith.constant 0 : i32
    %c0_i32_0 = arith.constant 0 : i32
    return %arg0, %c0_i32 : i32, i32
  }
  func.func @transform_1(%arg0: i32) -> (i32, i32) {
    %c0_i32 = arith.constant 0 : i32
    %c0_i32_0 = arith.constant 0 : i32
    return %arg0, %c0_i32 : i32, i32
  }
  func.func @transform_2(%arg0: i32) -> (i32, i32) {
    %c0_i32 = arith.constant 0 : i32
    %c0_i32_0 = arith.constant 0 : i32
    return %arg0, %c0_i32 : i32, i32
  }
  func.func @transform_3(%arg0: i32) -> (i32, i32) {
    %c0_i32 = arith.constant 0 : i32
    %c0_i32_0 = arith.constant 0 : i32
    return %arg0, %c0_i32 : i32, i32
  }
  func.func @transform_4(%arg0: i32) -> i32 {
    %c0_i32 = arith.constant 0 : i32
    %c0_i32_0 = arith.constant 0 : i32
    return %c0_i32 : i32
  }
}

</mosaic_0001>

<bundles_post_ra>
// kernel: tpu_custom_call.1
= control target key start
LH: loop header
LB: loop body
LE: loop exit
PB: predicated region body
PF: predicated region fallthrough
CT: control target
= control target key end

     0   :  { %9 = vsyncpa [#allocation6], 0  ;;  %s433_s0 = inlined_call_operand.hbm [shape: f32[16,128], index: 0, kind: input, shape index: {}]   ;;  %s434_s1 = inlined_call_operand.hbm [shape: f32[16,128], index: 1, kind: input, shape index: {}]   ;;  %s435_s2 = inlined_call_operand.hbm [shape: f32[16,128], index: 2, kind: input, shape index: {}]   ;;  %s436_s3 = inlined_call_operand.hbm [shape: f32[16,128], index: 3, kind: input, shape index: {}]   ;;  %s437_s4 = inlined_call_operand.hbm [shape: f32[1], index: 4, kind: output, shape index: {}]  }
   0x1   :  { %10 = vsyncpa [#allocation9], 0 }
   0x2   :  { %11 = vsyncpa [#allocation12], 0 }
   0x3   :  { %12 = vsyncpa [#allocation7], 0  ;;  %s30_s17 = sshll.u32 %s434_s1, 4  ;;  %s382_s18 = smov [#allocation8]   ;;  %s31_s17 = int_to_ptr.hbm [resolvable:$true] %s30_s17 }
   0x4   :  { %s32_s19 = sshll.u32 %s382_s18, 4  ;;  %s17_s22 = sshll.u32 %s433_s0, 4  ;;  %s33_s19 = int_to_ptr.vmem [resolvable:$true] %s32_s19  ;;  %s18_s22 = int_to_ptr.hbm [resolvable:$true] %s17_s22 }
   0x5   :  { %s383_s23 = smov 128   ;;  %s384_s24 = smov 8  }
   0x6   :  { %38 = dma.hbm_to_vmem [thread:$0]  %s31_s17, 256, %s33_s19, [#allocation9], %s383_s23, %s383_s23, %s384_s24  }
   0x7   :  { %s385_s25 = smov [#allocation5]   ;;  %s43_s29 = sshll.u32 %s435_s2, 4  ;;  %s44_s29 = int_to_ptr.hbm [resolvable:$true] %s43_s29 }
   0x8   :  { %s19_s26 = sshll.u32 %s385_s25, 4  ;;  %s56_s5 = sshll.u32 %s436_s3, 4  ;;  %s20_s26 = int_to_ptr.vmem [resolvable:$true] %s19_s26  ;;  %s57_s5 = int_to_ptr.hbm [resolvable:$true] %s56_s5 }
   0x9   :  { %25 = dma.hbm_to_vmem [thread:$0]  %s18_s22, 256, %s20_s26, [#allocation6], %s383_s23, %s383_s23, %s384_s24  }
   0xa   :  { %s386_s6 = smov [#allocation10]   ;;  %s387_s0 = smov [#allocation11]  }
   0xb   :  { %s45_s7 = sshll.u32 %s386_s6, 4  ;;  %s58_s8 = sshll.u32 %s387_s0, 4  ;;  %s46_s7 = int_to_ptr.vmem [resolvable:$true] %s45_s7  ;;  %s59_s8 = int_to_ptr.vmem [resolvable:$true] %s58_s8 }
   0xc   :  { %51 = dma.hbm_to_vmem [thread:$0]  %s44_s29, 256, %s46_s7, [#allocation9], %s383_s23, %s383_s23, %s384_s24  }
   0xd   :  { %64 = dma.hbm_to_vmem [thread:$0]  %s57_s5, 256, %s59_s8, [#allocation12], %s383_s23, %s383_s23, %s384_s24  }
   0xe   :  { %374 = dma.done.wait [#allocation6], 256  }
   0xf   :  { %375 = vsyncadd [#allocation6], 4294967040 }
  0x10   :  { %376 = dma.done.wait [#allocation9], 512  }
  0x11   :  { %377 = vsyncadd [#allocation9], 4294966784 }
  0x12   :  { %378 = dma.done.wait [#allocation12], 256  }
  0x13   :  { %379 = vsyncadd [#allocation12], 4294967040  ;;  %v91_v0 = vlaneseq  ;;  %v106_v7 = vld [vmem:[#allocation5] sm:$0xff]  ;;  %v107_v8 = vld [vmem:[#allocation5 + $0x8] sm:$0xff]  ;;  %v388_v58 = vmov 2048.0   ;;  %s231_s21 = sshll.u32 %s437_s4, 4  ;;  %s232_s21 = int_to_ptr.hbm [resolvable:$true] %s231_s21 }
  0x14   :  { %v110_v9 = vld [vmem:[#allocation8] sm:$0xff]  ;;  %v111_v11 = vld [vmem:[#allocation8 + $0x8] sm:$0xff]  ;;  %v114_v12 = vld [vmem:[#allocation10] sm:$0xff]  ;;  %262 = vrcp.f32 %v388_v58  ;;  %s389_s24 = smov [#allocation13]  }
  0x15   :  { %v92_v1 = vshrl.u32 %v91_v0, 7  ;;  %v95_v2 = vand.u32 127, %v91_v0  ;;  %v115_v13 = vld [vmem:[#allocation10 + $0x8] sm:$0xff]  ;;  %v118_v16 = vld [vmem:[#allocation11] sm:$0xff]  ;;  %v119_v17 = vld [vmem:[#allocation11 + $0x8] sm:$0xff] }
  0x17   :  { %v93_v3 = vadd.s32 8, %v92_v1  ;;  %v100_v4 = vmul.u32 128, %v92_v1 }
  0x19   :  { %v101_v5 = vmul.u32 128, %v93_v3  ;;  %v102_v6 = vadd.s32 %v100_v4, %v95_v2 }
  0x1a   :  { %v263_v59 = vpop.eup %262 }
  0x1b   :  { %v103_v10 = vadd.s32 %v101_v5, %v95_v2  ;;  %vm104_vm0 = vcmp.lt.s32.totalorder %v102_v6, 2048  ;;  %v213_v61 = vmul.f32 2048.0, %v263_v59  ;;  %vm217_vm5 = vweird.f32 %v263_v59 }
  0x1c   :  { %v108_v14 = vsel %vm104_vm0, %v106_v7, 0.0  ;;  %v112_v15 = vsel %vm104_vm0, %v110_v9, 0.0  ;;  %v116_v19 = vsel %vm104_vm0, %v114_v12, 0.0  ;;  %v120_v20 = vsel %vm104_vm0, %v118_v16, 0.0 }
  0x1d   :  { %vm105_vm1 = vcmp.lt.s32.totalorder %v103_v10, 2048  ;;  %v130_v18 = vmul.f32 %v112_v15, %v108_v14  ;;  %vm122_vm2 = vcmp.gt.f32.partialorder %v108_v14, 0.5  ;;  %v138_v31 = vadd.f32 %v112_v15, %v108_v14 }
  0x1e   :  { %v109_v21 = vsel %vm105_vm1, %v107_v8, 0.0  ;;  %v113_v22 = vsel %vm105_vm1, %v111_v11, 0.0  ;;  %v117_v23 = vsel %vm105_vm1, %v115_v13, 0.0  ;;  %v121_v24 = vsel %vm105_vm1, %v119_v17, 0.0 }
  0x1f   :  { %v131_v25 = vmul.f32 %v113_v22, %v109_v21  ;;  %vm123_vm3 = vcmp.gt.f32.partialorder %v109_v21, 0.5  ;;  %v124_v26 = vsel %vm122_vm2, %v116_v19, 0.0  ;;  %v139_v32 = vadd.f32 %v113_v22, %v109_v21 }
  0x20   :  { %v125_v27 = vsel %vm123_vm3, %v117_v23, 0.0  ;;  %v126_v29 = vsub.f32 %v124_v26, %v120_v20  ;;  %v214_v62 = vsub.f32 1.0, %v213_v61 }
  0x21   :  { %v157_v28 = vadd.f32 %v131_v25, %v130_v18  ;;  %v127_v30 = vsub.f32 %v125_v27, %v121_v24  ;;  %v169_v36 = vadd.f32 %v139_v32, %v138_v31 }
  0x22   :  { %v146_v33 = vmul.f32 %v126_v29, %v126_v29  ;;  %v215_v1 = vmul.f32 %v263_v59, %v214_v62 }
  0x23   :  { %158 = vadd.xlane.f32.xlu0 %v157_v28  ;;  %v147_v34 = vmul.f32 %v127_v30, %v127_v30 }
  0x24   :  { %v216_v6 = vadd.f32 %v263_v59, %v215_v1 }
  0x25   :  { %v181_v35 = vadd.f32 %v147_v34, %v146_v33 }
  0x26   :  { %v218_v10 = vsel %vm217_vm5, %v263_v59, %v216_v6 }
  0x27   :  { %182 = vadd.xlane.f32.xlu1 %v181_v35 }
  0x2b   :  { %170 = vadd.xlane.f32.xlu0 %v169_v36 }
  0x96   :  { %v159_v37 = vpop.xlane.xlu0 %158 }
  0x97   :  { %v160_v38 = vrot.slane %v159_v37, 4 }
  0x99   :  { %v161_v39 = vadd.f32 %v160_v38, %v159_v37 }
  0x9a   :  { %v183_v51 = vpop.xlane.xlu1 %182 }
  0x9b   :  { %v162_v40 = vrot.slane %v161_v39, 2  ;;  %v184_v52 = vrot.slane %v183_v51, 4 }
  0x9d   :  { %v163_v41 = vadd.f32 %v162_v40, %v161_v39  ;;  %v185_v53 = vadd.f32 %v184_v52, %v183_v51 }
  0x9e   :  { %v171_v42 = vpop.xlane.xlu0 %170 }
  0x9f   :  { %v172_v43 = vrot.slane %v171_v42, 4  ;;  %v164_v44 = vrot.slane %v163_v41, 1  ;;  %v186_v54 = vrot.slane %v185_v53, 2 }
  0xa1   :  { %v173_v45 = vadd.f32 %v172_v43, %v171_v42  ;;  %v165_v46 = vadd.f32 %v164_v44, %v163_v41  ;;  %v187_v55 = vadd.f32 %v186_v54, %v185_v53 }
  0xa3   :  { %v174_v47 = vrot.slane %v173_v45, 2  ;;  %244 = vpush %v165_v46  ;;  %v188_v56 = vrot.slane %v187_v55, 1 }
  0xa5   :  { %v175_v48 = vadd.f32 %v174_v47, %v173_v45  ;;  %v189_v57 = vadd.f32 %v188_v56, %v187_v55 }
  0xa7   :  { %v176_v49 = vrot.slane %v175_v48, 1 }
  0xa9   :  { %v177_v50 = vadd.f32 %v176_v49, %v175_v48 }
  0xab   :  { %246 = vpush %v177_v50 }
  0xac   :  { %248 = vpush %v189_v57 }
  0xd4   :  { %s427_s2 = spop %244 }
  0xd5   :  { %s191_s10 = smul.f32 2.0, %s427_s2 }
  0xd7   :  { %s192_s11 = sadd.f32 10000.0, %s191_s10 }
  0xdc   :  { %s247_s3 = spop %246 }
  0xdd   :  { %s193_s9 = sadd.f32 10000.0, %s247_s3  ;;  %s249_s12 = spop %248 }
  0xdf   :  { %v194_v60 = vstv %s193_s9 }
  0xe0   :  { %264 = vrcp.f32 %v194_v60  ;;  %v206_v3 = vand.u32 2147483648, %v194_v60  ;;  %v204_v5 = vand.u32 2147483647, %v194_v60  ;;  %vm200_vm6 = vweird.f32 %v194_v60 }
  0xe2   :  { %v207_v8 = vor.u32 1.1754944e-38, %v206_v3  ;;  %vm205_vm8 = vcmp.eq.f32.partialorder %v204_v5, 8.507059e+37 }
  0xe6   :  { %v265_v63 = vpop.eup %264 }
  0xe7   :  { %v196_v0 = vmul.f32 %v265_v63, %v194_v60  ;;  %vm201_vm4 = vweird.f32 %v265_v63 }
  0xe8   :  { %vm202_vm7 = vmor %vm200_vm6, %vm201_vm4 }
  0xe9   :  { %v197_v2 = vsub.f32 1.0, %v196_v0 }
  0xeb   :  { %v198_v4 = vmul.f32 %v265_v63, %v197_v2 }
  0xed   :  { %v199_v7 = vadd.f32 %v265_v63, %v198_v4 }
  0xef   :  { %v203_v9 = vsel %vm202_vm7, %v265_v63, %v199_v7 }
  0xf0   :  { %v208_v11 = vsel %vm205_vm8, %v207_v8, %v203_v9 }
  0xf1   :  { %250 = vpush %v208_v11 }
  0xf2   :  { %252 = vpush %v218_v10 }
 0x122   :  { %s251_s13 = spop %250 }
 0x123   :  { %s210_s14 = smul.f32 %s251_s13, %s192_s11  ;;  %s253_s15 = spop %252 }
 0x124   :  { %s220_s16 = smul.f32 %s253_s15, %s249_s12 }
 0x125   :  { %s211_s17 = ssub.f32 1.0, %s210_s14 }
 0x126   :  { %s222_s18 = smul.f32 0.5, %s220_s16 }
 0x127   :  { %s221_s22 = smul.f32 0.5, %s211_s17 }
 0x129   :  { %s223_s23 = sadd.f32 %s222_s18, %s221_s22 }
 0x12b   :  { %225 = sst [smem:[#allocation13]] %s223_s23 }
 0x12c   :  { %234 = dma.smem_to_hbm %s389_s24, 16, %s232_s21, [#allocation7]  }
 0x12d   :  { %380 = dma.done.wait [#allocation7], 16  }
 0x12e   :  { %381 = vsyncadd [#allocation7], 4294967280 }
 0x12f   :  { %239 = sfence }
 0x130   :  { %240 = vsyncpa [#allocation6], 1 }
 0x131   :  { %241 = vsyncpa [#allocation9], 1 }
 0x132   :  { %242 = vsyncpa [#allocation12], 1 }
 0x133   :  { %243 = vsyncpa [#allocation7], 1 }

</bundles_post_ra>
